<compile_context>
chip_gen: v7x
topology: tpu7x:2x2x1
jax: 0.10.0
libtpu: 0.0.40
codegen_flags: <defaults>
</compile_context>

<pallas_src>
import jax
import jax.numpy as jnp
from jax import lax
from jax.experimental import pallas as pl
from jax.experimental.pallas import tpu as pltpu

K = 7        # kernel_size
STRIDE = 3   # the "padding" positional arg of the PyTorch module -> stride slot
PAD = 0      # actual padding used by the PyTorch module (defaulted)


# ----------------------------------------------------------------------------
# Hardware queries (defensive: fall back to conservative values)
# ----------------------------------------------------------------------------
def _vmem_capacity_bytes():
    try:
        info = pltpu.get_tpu_info()
        cap = getattr(info, "vmem_capacity_bytes", None)
        if cap:
            return int(cap)
    except Exception:
        pass
    return 64 * 1024 * 1024   # conservative: v7x per-TC physical VMEM


def _num_tensorcores():
    try:
        info = pltpu.get_tpu_info()
        for attr in ("num_tensorcores", "tensorcores_per_chip", "num_cores",
                     "core_count"):
            v = getattr(info, attr, None)
            if isinstance(v, int) and v > 0:
                return min(int(v), 2)
    except Exception:
        pass
    return 1   # safe default: never shrink blocks for phantom cores


# ----------------------------------------------------------------------------
# Host-side weight folding
# ----------------------------------------------------------------------------
def _build_weighted_im2col(conv_weight, C, H, W, HO, WO, no_pad):
    """Fold the strided KxK gather, conv weights and 1/C into one matrix.

    Returns M of shape (2*H*W, no_pad):
      rows [0, H*W)       : avg-branch weights (already divided by C)
      rows [H*W, 2*H*W)   : max-branch weights
      M[h*W+w, oh*WO+ow] = w[kh, kw]  where h == S*oh+kh, w == S*ow+kw
    (columns >= HO*WO are zero padding for lane-dense output stores).
    """
    wgt = conv_weight.reshape(2, K, K).astype(jnp.float32)      # [avg, max]

    kh = jnp.arange(K)
    oh = jnp.arange(HO)
    h = jnp.arange(H)
    row_sel = (h[None, None, :] ==
               (STRIDE * oh[None, :, None] + kh[:, None, None])
               ).astype(jnp.float32)                            # (K, HO, H)

    kw = jnp.arange(K)
    ow = jnp.arange(WO)
    w = jnp.arange(W)
    col_sel = (w[None, None, :] ==
               (STRIDE * ow[None, :, None] + kw[:, None, None])
               ).astype(jnp.float32)                            # (K, WO, W)

    # One-hot contraction (at most one nonzero term -> exact f32).
    T = jnp.einsum('cab,aih,bjv->chvij', wgt, row_sel, col_sel,
                   precision=lax.Precision.HIGHEST)             # (2, H, W, HO, WO)
    M = T.reshape(2, H * W, HO * WO)
    M = M.at[0].multiply(1.0 / C)       # fold the channel-mean divide
    if no_pad > HO * WO:
        M = jnp.pad(M, ((0, 0), (0, 0), (0, no_pad - HO * WO)))
    return M.reshape(2 * H * W, no_pad)


# ----------------------------------------------------------------------------
# Kernel
# ----------------------------------------------------------------------------
def spatial_attention_kernel(x_ref, m_ref, o_ref, lhs_ref):
    """x_ref:   (TB, C, HW)      input block (native dtype), resident across j
       m_ref:   (2*HW, TN)  f32  weighted im2col tile (avg rows over max rows)
       o_ref:   (TB, 1, TN) f32  lane-dense output tile
       lhs_ref: (TB, 2*HW)  f32  cached [channel_sum | channel_max] per b-block
    """
    TB, C, HW = x_ref.shape

    # Compute the channel reduction once per batch block (first column tile),
    # in a single pass over the input (fused sum+max per chunk).
    @pl.when(pl.program_id(1) == 0)
    def _compute_lhs():
        CH = 8                       # sublane-sized channel chunks
        nfull = C // CH
        rem = C - nfull * CH

        def chunk_stats(c0, size):
            xc = x_ref[:, pl.ds(c0, size), :].astype(jnp.float32)
            return jnp.sum(xc, axis=1), jnp.max(xc, axis=1)

        if nfull == 0:
            s, m = chunk_stats(0, C)
        else:
            s, m = chunk_stats(0, CH)
            if nfull > 1:
                def body(i, carry):
                    s_acc, m_acc = carry
                    c0 = pl.multiple_of(i * CH, CH)
                    cs, cm = chunk_stats(c0, CH)
                    return s_acc + cs, jnp.maximum(m_acc, cm)
                s, m = lax.fori_loop(1, nfull, body, (s, m),
                                     unroll=min(8, nfull - 1))
            if rem:
                cs, cm = chunk_stats(nfull * CH, rem)
                s, m = s + cs, jnp.maximum(m, cm)

        lhs_ref[:, :HW] = s          # 1/C is folded into the avg half of m_ref
        lhs_ref[:, HW:] = m

    # Single fused MXU matmul: (TB, 2*HW) @ (2*HW, TN)
    pre = jnp.dot(lhs_ref[...], m_ref[...], preferred_element_type=jnp.float32)
    o_ref[:, 0, :] = jax.nn.sigmoid(pre)


# ----------------------------------------------------------------------------
# Wrapper
# ----------------------------------------------------------------------------
def spatial_attention(x, conv_weight):
    """x: (B, C, H, W), conv_weight: (1, 2, K, K) -> (B, 1, HO, WO) f32."""
    B, C, H, W = x.shape
    HO = (H + 2 * PAD - K) // STRIDE + 1
    WO = (W + 2 * PAD - K) // STRIDE + 1
    assert HO > 0 and WO > 0, "spatial size too small for a 7x7 stride-3 window"
    HW = H * W
    NO = HO * WO
    itemsize = jnp.dtype(x.dtype).itemsize

    # ---- VMEM accounting ----------------------------------------------------
    vmem_cap = _vmem_capacity_bytes()                       # 64 MiB on v7x, 128 MiB v5e/v6e
    vmem_limit = int(min(vmem_cap * 3 // 4, 96 * 1024 * 1024))
    budget = vmem_limit - (6 << 20)                         # compiler-scratch headroom

    # M residency / output-column tiling.
    no_pad_min = max(128, pl.cdiv(NO, 128) * 128)
    m_full_bytes = (2 * HW) * no_pad_min * 4
    if m_full_bytes <= budget // 2:
        TN = no_pad_min
        m_buffers = 1                                       # grid-invariant -> single buffer
    else:
        # TODO(synk): for very large H*W also tile the 2*HW contraction axis;
        # here only the output-column axis is tiled (covers moderate sizes).
        m_buffers = 2
        TN = ((budget // 2) // (m_buffers * 2 * HW * 4)) // 128 * 128
        TN = int(max(128, min(TN, no_pad_min)))
    NO_PAD = pl.cdiv(no_pad_min, TN) * TN
    num_col_tiles = NO_PAD // TN
    m_bytes = m_buffers * 2 * HW * TN * 4

    # Batch tile: input double buffer + output double buffer + lhs scratch.
    per_tb_bytes = 2 * C * HW * itemsize + 2 * TN * 4 + 2 * HW * 4
    TB = max(1, (budget - m_bytes) // per_tb_bytes)
    TB = int(min(B, TB, 256))
    if TB > 8:
        TB = (TB // 8) * 8

    # Spread batch steps across both TensorCores only where there are two (v7x);
    # single-TC chips (v5e/v6e) keep the largest possible block.
    num_tc = _num_tensorcores()
    if num_tc > 1 and B > 1:
        steps = max(num_tc, pl.cdiv(B, TB))
        steps = pl.cdiv(steps, num_tc) * num_tc             # balanced, even step count
        TB = max(1, pl.cdiv(B, steps))

    num_b_steps = pl.cdiv(B, TB)
    B_pad = num_b_steps * TB

    # Folded weights: (2*HW, NO_PAD), avg rows (already /C) stacked over max rows.
    M = _build_weighted_im2col(conv_weight, C, H, W, HO, WO, NO_PAD)

    # Lane-dense input layout; keep native dtype (no host-side upcast).
    x_flat = x.reshape(B, C, HW)
    if B_pad != B:
        x_flat = jnp.pad(x_flat, ((0, B_pad - B), (0, 0), (0, 0)))

    m_spec_kwargs = dict(block_shape=(2 * HW, TN), index_map=lambda b, j: (0, j))
    if m_buffers == 1:
        try:
            m_spec = pl.BlockSpec(pipeline_mode=pl.Buffered(1), **m_spec_kwargs)
        except TypeError:   # older BlockSpec without pipeline_mode
            m_spec = pl.BlockSpec(**m_spec_kwargs)
    else:
        m_spec = pl.BlockSpec(**m_spec_kwargs)

    out = pl.pallas_call(
        spatial_attention_kernel,
        out_shape=jax.ShapeDtypeStruct((B_pad, 1, NO_PAD), jnp.float32),
        grid_spec=pltpu.PrefetchScalarGridSpec(
            num_scalar_prefetch=0,
            grid=(num_b_steps, num_col_tiles),
            in_specs=[
                pl.BlockSpec((TB, C, HW), lambda b, j: (b, 0, 0)),
                m_spec,
            ],
            out_specs=pl.BlockSpec((TB, 1, TN), lambda b, j: (b, 0, j)),
            scratch_shapes=[pltpu.VMEM((TB, 2 * HW), jnp.float32)],
        ),
        compiler_params=pltpu.CompilerParams(
            dimension_semantics=("parallel", "arbitrary"),
            vmem_limit_bytes=vmem_limit),
    )(x_flat, M)

    return out[:B, 0, :NO].reshape(B, 1, HO, WO)


# ----------------------------------------------------------------------------
# Pure-JAX reference matching the literal PyTorch forward
# ----------------------------------------------------------------------------
def reference(x, conv_weight):
    avg = jnp.mean(x, axis=1, keepdims=True)
    mx = jnp.max(x, axis=1, keepdims=True)
    xc = jnp.concatenate([avg, mx], axis=1)
    y = lax.conv_general_dilated(
        xc, conv_weight,
        window_strides=(STRIDE, STRIDE),
        padding=[(PAD, PAD), (PAD, PAD)],
        dimension_numbers=("NCHW", "OIHW", "NCHW"),
        precision=lax.Precision.HIGHEST)
    return jax.nn.sigmoid(y)


if __name__ == "__main__":
    key = jax.random.PRNGKey(0)
    kx, kw = jax.random.split(key)

    # Deterministic synthetic inputs / parameters (no checkpoint loading).
    x = jax.random.normal(kx, (2, 4, 16, 16), dtype=jnp.float32)
    conv_weight = jax.random.normal(kw, (1, 2, K, K), dtype=jnp.float32) * 0.1

    out = jax.block_until_ready(spatial_attention(x, conv_weight))
    ref = jax.block_until_ready(reference(x, conv_weight))

    assert out.shape == ref.shape, (out.shape, ref.shape)
    max_err = float(jnp.max(jnp.abs(out - ref)))
    if max_err < 1e-5:
        print("KERNEL_OK")
    else:
        print(f"MISMATCH max_err={max_err}")
</pallas_src>

<mosaic_0001>
module attributes {stable_mosaic.version = 11 : i64} {
  func.func @spatial_attention_kernel(%arg0: i32, %arg1: i32, %arg2: memref<2x4x256xf32, #tpu.memory_space<vmem>>, %arg3: memref<512x128xf32, #tpu.memory_space<vmem>>, %arg4: memref<2x1x128xf32, #tpu.memory_space<vmem>>, %arg5: memref<2x512xf32, #tpu.memory_space<vmem>>) attributes {dimension_semantics = [#tpu.dimension_semantics<parallel>, #tpu.dimension_semantics<arbitrary>], iteration_bounds = array<i64: 1, 1>, scalar_prefetch = 0 : i64, scratch_operands = 1 : i64, tpu.core_type = #tpu.core_type<tc>, window_params = [{transform_indices = @transform_0, window_bounds = array<i64: 2, 4, 256>}, {pipeline_mode = #tpu.pipeline_mode<synchronous>, transform_indices = @transform_1, window_bounds = array<i64: 512, 128>}, {transform_indices = @transform_2, window_bounds = array<i64: 2, 1, 128>}]} {
    %c0_i32 = arith.constant 0 : i32
    %0 = arith.cmpi eq, %arg1, %c0_i32 : i32
    %1 = arith.extui %0 : i1 to i32
    %c0_i32_0 = arith.constant 0 : i32
    %2 = arith.cmpi ne, %1, %c0_i32_0 : i32
    scf.if %2 {
      %c0_8 = arith.constant 0 : index
      %c0_9 = arith.constant 0 : index
      %c0_10 = arith.constant 0 : index
      %14 = vector.load %arg2[%c0_8, %c0_9, %c0_10] : memref<2x4x256xf32, #tpu.memory_space<vmem>>, vector<2x4x256xf32>
      %cst_11 = arith.constant dense<0.000000e+00> : vector<2x256xf32>
      %15 = vector.multi_reduction <add>, %14, %cst_11 [1] : vector<2x4x256xf32> to vector<2x256xf32>
      %cst_12 = arith.constant dense<0xFF800000> : vector<2x256xf32>
      %16 = vector.multi_reduction <maximumf>, %14, %cst_12 [1] : vector<2x4x256xf32> to vector<2x256xf32>
      %c0_13 = arith.constant 0 : index
      %c0_14 = arith.constant 0 : index
      %17 = vector.load %arg5[%c0_13, %c0_14] : memref<2x512xf32, #tpu.memory_space<vmem>>, vector<2x256xf32>
      tpu.vector_store %arg5[%c0_13, %c0_14], %15 {strides = array<i32>} : memref<2x512xf32, #tpu.memory_space<vmem>>, vector<2x256xf32>,
      %c0_15 = arith.constant 0 : index
      %c256 = arith.constant 256 : index
      %18 = vector.load %arg5[%c0_15, %c256] : memref<2x512xf32, #tpu.memory_space<vmem>>, vector<2x256xf32>
      tpu.vector_store %arg5[%c0_15, %c256], %16 {strides = array<i32>} : memref<2x512xf32, #tpu.memory_space<vmem>>, vector<2x256xf32>,
    } else {
    }
    %c0 = arith.constant 0 : index
    %c0_1 = arith.constant 0 : index
    %3 = vector.load %arg5[%c0, %c0_1] : memref<2x512xf32, #tpu.memory_space<vmem>>, vector<2x512xf32>
    %c0_2 = arith.constant 0 : index
    %c0_3 = arith.constant 0 : index
    %4 = vector.load %arg3[%c0_2, %c0_3] : memref<512x128xf32, #tpu.memory_space<vmem>>, vector<512x128xf32>
    %cst = arith.constant dense<0.000000e+00> : vector<2x128xf32>
    %5 = tpu.matmul %3, %4, %cst {dimension_numbers = #tpu.dot_dimension_numbers<[1], [0], [0], [1], [0, 0, 1, 1], [], []>} : vector<2x512xf32>, vector<512x128xf32>, vector<2x128xf32> -> vector<2x128xf32>
    %6 = arith.negf %5 : vector<2x128xf32>
    %7 = math.exp %6 : vector<2x128xf32>
    %cst_4 = arith.constant 1.000000e+00 : f32
    %8 = vector.broadcast %cst_4 : f32 to vector<2x128xf32>
    %9 = arith.addf %8, %7 : vector<2x128xf32>
    %10 = arith.divf %8, %9 : vector<2x128xf32>
    %c0_5 = arith.constant 0 : index
    %c0_6 = arith.constant 0 : index
    %c0_7 = arith.constant 0 : index
    %11 = vector.load %arg4[%c0_5, %c0_6, %c0_7] : memref<2x1x128xf32, #tpu.memory_space<vmem>>, vector<2x1x128xf32>
    %12 = vector.shape_cast %11 : vector<2x1x128xf32> to vector<2x128xf32>
    %13 = vector.shape_cast %10 : vector<2x128xf32> to vector<2x1x128xf32>
    tpu.vector_store %arg4[%c0_5, %c0_6, %c0_7], %13 {strides = array<i32>} : memref<2x1x128xf32, #tpu.memory_space<vmem>>, vector<2x1x128xf32>,
    return
  }
  func.func @transform_0(%arg0: i32, %arg1: i32) -> (i32, i32, i32) {
    %c0_i32 = arith.constant 0 : i32
    %c0_i32_0 = arith.constant 0 : i32
    %c0_i32_1 = arith.constant 0 : i32
    return %arg0, %c0_i32, %c0_i32_0 : i32, i32, i32
  }
  func.func @transform_1(%arg0: i32, %arg1: i32) -> (i32, i32) {
    %c0_i32 = arith.constant 0 : i32
    %c0_i32_0 = arith.constant 0 : i32
    return %c0_i32, %arg1 : i32, i32
  }
  func.func @transform_2(%arg0: i32, %arg1: i32) -> (i32, i32, i32) {
    %c0_i32 = arith.constant 0 : i32
    %c0_i32_0 = arith.constant 0 : i32
    return %arg0, %c0_i32, %arg1 : i32, i32, i32
  }
}

</mosaic_0001>

<bundles_post_ra>
// kernel: tpu_custom_call.1
= control target key start
LH: loop header
LB: loop body
LE: loop exit
PB: predicated region body
PF: predicated region fallthrough
CT: control target
= control target key end

     0   :  { %7 = vsyncpa [#allocation4], 0  ;;  %s768_s0 = inlined_call_operand.hbm [shape: f32[2,4,256], index: 0, kind: input, shape index: {}]   ;;  %s769_s1 = inlined_call_operand.hbm [shape: f32[512,128], index: 1, kind: input, shape index: {}]   ;;  %s770_s2 = inlined_call_operand.hbm [shape: f32[2,1,128], index: 2, kind: output, shape index: {}]  }
   0x1   :  { %8 = vsyncpa [#allocation7], 0 }
   0x2   :  { %9 = vsyncpa [#allocation5], 0  ;;  %s676_s9 = smov [#allocation3]   ;;  %s604_s13 = scalar_lea.hbm %s768_s0, 256 }
   0x3   :  { %s15_s10 = sshll.u32 %s676_s9, 4  ;;  %p605_p0 = scmp.ne.s32.totalorder %s768_s0, %s604_s13  ;;  %s16_s10 = int_to_ptr.vmem [resolvable:$true] %s15_s10 }
   0x4   :  { %p608_p1 = scmp.lt.u32.totalorder %s604_s13, %s768_s0 }
   0x6   :  { %p610_p2 = pnand %p608_p1, %p605_p0 }
   0x8   :  { %613 = shalt.err (!%p610_p2)
}
   0x9   :  { %s614_s18 = scalar_lea.vmem %s16_s10, 256  ;;  %p619_p4 = scmp.lt.s32.totalorder %s16_s10, %s16_s10 }
   0xa   :  { %p615_p3 = scmp.ne.s32.totalorder %s16_s10, %s614_s18  ;;  %p620_p5 = scmp.lt.s32.totalorder %s614_s18, %s614_s18 }
   0xc   :  { %p621_p6 = por %p620_p5, %p619_p4 }
   0xe   :  { %p622_p7 = pnand %p621_p6, %p615_p3 }
  0x10   :  { %625 = shalt.err (!%p622_p7)
}
  0x11   :  { %s677_s19 = smov 128   ;;  %s678_s20 = smov 8  }
  0x12   :  { %21 = dma.hbm_to_vmem [thread:$0]  %s768_s0, 256, %s16_s10, [#allocation4], %s677_s19, %s677_s19, %s678_s20  }
  0x13   :  { %s679_s23 = smov [#allocation6]   ;;  %s626_s27 = scalar_lea.hbm %s769_s1, 8192 }
  0x14   :  { %s27_s24 = sshll.u32 %s679_s23, 4  ;;  %p627_p8 = scmp.ne.s32.totalorder %s769_s1, %s626_s27  ;;  %s28_s24 = int_to_ptr.vmem [resolvable:$true] %s27_s24 }
  0x15   :  { %p630_p9 = scmp.lt.u32.totalorder %s626_s27, %s769_s1 }
  0x17   :  { %p632_p10 = pnand %p630_p9, %p627_p8 }
  0x19   :  { %635 = shalt.err (!%p632_p10)
}
  0x1a   :  { %s636_s4 = scalar_lea.vmem %s28_s24, 8192  ;;  %p641_p12 = scmp.lt.s32.totalorder %s28_s24, %s28_s24 }
  0x1b   :  { %p637_p11 = scmp.ne.s32.totalorder %s28_s24, %s636_s4  ;;  %p642_p13 = scmp.lt.s32.totalorder %s636_s4, %s636_s4 }
  0x1d   :  { %p643_p0 = por %p642_p13, %p641_p12 }
  0x1f   :  { %p644_p1 = pnand %p643_p0, %p637_p11 }
  0x21   :  { %647 = shalt.err (!%p644_p1)
}
  0x22   :  { %33 = dma.hbm_to_vmem [thread:$0]  %s769_s1, 8192, %s28_s24, [#allocation7], %s677_s19, %s677_s19, %s678_s20  }
  0x23   :  { %670 = dma.done.wait [#allocation4], 256  }
  0x24   :  { %671 = vsyncadd [#allocation4], 4294967040 }
  0x25   :  { %672 = dma.done.wait [#allocation7], 8192  }
  0x26   :  { %673 = vsyncadd [#allocation7], 4294959104  ;;  %v190_v0 = vld [vmem:[#allocation6 + $0x80] sm:$0xff]  ;;  %v191_v1 = vld [vmem:[#allocation6 + $0x88] sm:$0xff]  ;;  %vm52_vm0 = vcmask 1043456   ;;  %vm134_vm1 = vcmask 1041409  }
  0x27   :  { %v174_v2 = vld [vmem:[#allocation6] sm:$0xff]  ;;  %v524_v3 = vpack.c.bf16 %v191_v1, %v190_v0  ;;  %v175_v4 = vld [vmem:[#allocation6 + $0x8] sm:$0xff]  ;;  %v192_v11 = vld [vmem:[#allocation6 + $0x90] sm:$0xff]  ;;  %vm136_vm2 = vcmask 1043459   ;;  %vm138_vm3 = vcmask 1045509   ;;  %vm140_vm4 = vcmask 1047559  }
  0x28   :  { %v222_v5 = vld [vmem:[#allocation6 + $0x180] sm:$0xff]  ;;  %v223_v6 = vld [vmem:[#allocation6 + $0x188] sm:$0xff]  ;;  %v526_v7 = vpack.c.bf16 %v175_v4, %v174_v2  ;;  %v193_v13 = vld [vmem:[#allocation6 + $0x98] sm:$0xff]  ;;  %v117_v2 = vlaneseq  ;;  %s682_s1 = smov [#allocation8]  }
  0x29   :  { %v556_v8 = vpack.c.bf16 %v223_v6, %v222_v5  ;;  %v206_v9 = vld [vmem:[#allocation6 + $0x100] sm:$0xff]  ;;  %v207_v10 = vld [vmem:[#allocation6 + $0x108] sm:$0xff]  ;;  %525 = vmatprep.subr.bf16.mxu0 %v524_v3  ;;  %v176_v14 = vld [vmem:[#allocation6 + $0x10] sm:$0xff]  ;;  %v528_v16 = vpack.c.bf16 %v193_v13, %v192_v11  ;;  %s438_s6 = sshll.u32 %s682_s1, 4  ;;  %s439_s6 = int_to_ptr.vmem [resolvable:$true] %s438_s6 }
  0x2a   :  { %v558_v12 = vpack.c.bf16 %v207_v10, %v206_v9  ;;  %v177_v15 = vld [vmem:[#allocation6 + $0x18] sm:$0xff]  ;;  %527 = vmatpush3.bf16.msra.mxu0 %v526_v7  ;;  %v224_v18 = vld [vmem:[#allocation6 + $0x190] sm:$0xff]  ;;  %v194_v23 = vld [vmem:[#allocation6 + $0xa0] sm:$0xff]  ;;  %s648_s7 = scalar_lea.vmem %s439_s6, 32  ;;  %p653_p3 = scmp.lt.s32.totalorder %s439_s6, %s439_s6 }
  0x2b   :  { %557 = vmatprep.subr.bf16.mxu1 %v556_v8  ;;  %v530_v17 = vpack.c.bf16 %v177_v15, %v176_v14  ;;  %v225_v19 = vld [vmem:[#allocation6 + $0x198] sm:$0xff]  ;;  %v208_v20 = vld [vmem:[#allocation6 + $0x110] sm:$0xff]  ;;  %v195_v24 = vld [vmem:[#allocation6 + $0xa8] sm:$0xff]  ;;  %529 = vmatprep.subr.bf16.mxu0 %v528_v16  ;;  %p649_p2 = scmp.ne.s32.totalorder %s439_s6, %s648_s7  ;;  %p654_p4 = scmp.lt.s32.totalorder %s648_s7, %s648_s7 }
  0x2c   :  { %559 = vmatpush3.bf16.msra.mxu1 %v558_v12  ;;  %v560_v21 = vpack.c.bf16 %v225_v19, %v224_v18  ;;  %v209_v22 = vld [vmem:[#allocation6 + $0x118] sm:$0xff]  ;;  %v532_v26 = vpack.c.bf16 %v195_v24, %v194_v23  ;;  %v178_v27 = vld [vmem:[#allocation6 + $0x20] sm:$0xff]  ;;  %v179_v28 = vld [vmem:[#allocation6 + $0x28] sm:$0xff]  ;;  %v680_v12 = vmov 1983009808   ;;  %v734_v23 = vshrl.u32 %v117_v2, 7 }
  0x2d   :  { %v562_v25 = vpack.c.bf16 %v209_v22, %v208_v20  ;;  %v226_v29 = vld [vmem:[#allocation6 + $0x1a0] sm:$0xff]  ;;  %v227_v30 = vld [vmem:[#allocation6 + $0x1a8] sm:$0xff]  ;;  %v534_v33 = vpack.c.bf16 %v179_v28, %v178_v27  ;;  %v196_v35 = vld [vmem:[#allocation6 + $0xb0] sm:$0xff]  ;;  %v728_v13 = vunpack.c.l.s4 %v680_v12  ;;  %p655_p5 = por %p654_p4, %p653_p3 }
  0x2e   :  { %561 = vmatprep.subr.bf16.mxu1 %v560_v21  ;;  %v210_v31 = vld [vmem:[#allocation6 + $0x120] sm:$0xff]  ;;  %v211_v32 = vld [vmem:[#allocation6 + $0x128] sm:$0xff]  ;;  %531 = vmatpush3.bf16.msra.mxu0 %v530_v17  ;;  %v564_v34 = vpack.c.bf16 %v227_v30, %v226_v29  ;;  %v197_v36 = vld [vmem:[#allocation6 + $0xb8] sm:$0xff] }
  0x2f   :  { %v180_v37 = vld [vmem:[#allocation6 + $0x30] sm:$0xff]  ;;  %533 = vmatprep.subr.bf16.mxu0 %v532_v26  ;;  %v566_v38 = vpack.c.bf16 %v211_v32, %v210_v31  ;;  %v536_v39 = vpack.c.bf16 %v197_v36, %v196_v35  ;;  %v181_v40 = vld [vmem:[#allocation6 + $0x38] sm:$0xff]  ;;  %v198_v46 = vld [vmem:[#allocation6 + $0xc0] sm:$0xff]  ;;  %p656_p6 = pnand %p655_p5, %p649_p2 }
  0x30   :  { %563 = vmatpush3.bf16.msra.mxu1 %v562_v25  ;;  %v228_v41 = vld [vmem:[#allocation6 + $0x1b0] sm:$0xff]  ;;  %v229_v42 = vld [vmem:[#allocation6 + $0x1b8] sm:$0xff]  ;;  %v199_v47 = vld [vmem:[#allocation6 + $0xc8] sm:$0xff]  ;;  %v538_v50 = vpack.c.bf16 %v181_v40, %v180_v37  ;;  %v116_v37 = vunpack.c.0.s8 %v728_v13 }
  0x31   :  { %565 = vmatprep.subr.bf16.mxu1 %v564_v34  ;;  %v568_v43 = vpack.c.bf16 %v229_v42, %v228_v41  ;;  %v212_v44 = vld [vmem:[#allocation6 + $0x130] sm:$0xff]  ;;  %v213_v45 = vld [vmem:[#allocation6 + $0x138] sm:$0xff]  ;;  %v182_v48 = vld [vmem:[#allocation6 + $0x40] sm:$0xff]  ;;  %v540_v55 = vpack.c.bf16 %v199_v47, %v198_v46 }
  0x32   :  { %v183_v49 = vld [vmem:[#allocation6 + $0x48] sm:$0xff]  ;;  %535 = vmatpush3.bf16.msra.mxu0 %v534_v33  ;;  %v230_v51 = vld [vmem:[#allocation6 + $0x1c0] sm:$0xff]  ;;  %v570_v54 = vpack.c.bf16 %v213_v45, %v212_v44  ;;  %v200_v57 = vld [vmem:[#allocation6 + $0xd0] sm:$0xff] }
  0x33   :  { %v231_v52 = vld [vmem:[#allocation6 + $0x1c8] sm:$0xff]  ;;  %v214_v53 = vld [vmem:[#allocation6 + $0x140] sm:$0xff]  ;;  %537 = vmatprep.subr.bf16.mxu0 %v536_v39  ;;  %v201_v58 = vld [vmem:[#allocation6 + $0xd8] sm:$0xff]  ;;  %v542_v3 = vpack.c.bf16 %v183_v49, %v182_v48 }
  0x34   :  { %567 = vmatpush3.bf16.msra.mxu1 %v566_v38  ;;  %v215_v56 = vld [vmem:[#allocation6 + $0x148] sm:$0xff]  ;;  %v572_v59 = vpack.c.bf16 %v231_v52, %v230_v51  ;;  %v184_v60 = vld [vmem:[#allocation6 + $0x50] sm:$0xff]  ;;  %v185_v61 = vld [vmem:[#allocation6 + $0x58] sm:$0xff]  ;;  %v544_v8 = vpack.c.bf16 %v201_v58, %v200_v57 }
  0x35   :  { %569 = vmatprep.subr.bf16.mxu1 %v568_v43  ;;  %v232_v62 = vld [vmem:[#allocation6 + $0x1d0] sm:$0xff]  ;;  %v233_v63 = vld [vmem:[#allocation6 + $0x1d8] sm:$0xff]  ;;  %v202_v4 = vld [vmem:[#allocation6 + $0xe0] sm:$0xff]  ;;  %v574_v7 = vpack.c.bf16 %v215_v56, %v214_v53  ;;  %v546_v18 = vpack.c.bf16 %v185_v61, %v184_v60 }
  0x36   :  { %v216_v0 = vld [vmem:[#allocation6 + $0x150] sm:$0xff]  ;;  %v217_v1 = vld [vmem:[#allocation6 + $0x158] sm:$0xff]  ;;  %539 = vmatpush3.bf16.msra.mxu0 %v538_v50  ;;  %v203_v5 = vld [vmem:[#allocation6 + $0xe8] sm:$0xff]  ;;  %v576_v14 = vpack.c.bf16 %v233_v63, %v232_v62 }
  0x37   :  { %v724_v6 = vld [vmem:[#allocation6 + $0x60] sm:$0xff]  ;;  %541 = vmatprep.subr.bf16.mxu0 %v540_v55  ;;  %v726_v9 = vld [vmem:[#allocation6 + $0x68] sm:$0xff]  ;;  %v204_v17 = vld [vmem:[#allocation6 + $0xf0] sm:$0xff]  ;;  %v578_v19 = vpack.c.bf16 %v217_v1, %v216_v0  ;;  %v548_v24 = vpack.c.bf16 %v203_v5, %v202_v4 }
  0x38   :  { %571 = vmatpush3.bf16.msra.mxu1 %v570_v54  ;;  %v234_v10 = vld [vmem:[#allocation6 + $0x1e0] sm:$0xff]  ;;  %v235_v11 = vld [vmem:[#allocation6 + $0x1e8] sm:$0xff]  ;;  %v205_v20 = vld [vmem:[#allocation6 + $0xf8] sm:$0xff]  ;;  %v550_v25 = vpack.c.bf16 %v726_v9, %v724_v6 }
  0x39   :  { %573 = vmatprep.subr.bf16.mxu1 %v572_v59  ;;  %v218_v15 = vld [vmem:[#allocation6 + $0x160] sm:$0xff]  ;;  %v219_v16 = vld [vmem:[#allocation6 + $0x168] sm:$0xff]  ;;  %v730_v21 = vld [vmem:[#allocation6 + $0x70] sm:$0xff]  ;;  %v580_v26 = vpack.c.bf16 %v235_v11, %v234_v10  ;;  %v552_v31 = vpack.c.bf16 %v205_v20, %v204_v17 }
  0x3a   :  { %v732_v22 = vld [vmem:[#allocation6 + $0x78] sm:$0xff]  ;;  %543 = vmatpush3.bf16.msra.mxu0 %v542_v3  ;;  %v582_v27 = vpack.c.bf16 %v219_v16, %v218_v15  ;;  %v236_v28 = vld [vmem:[#allocation6 + $0x1f0] sm:$0xff] }
  0x3b   :  { %v237_v29 = vld [vmem:[#allocation6 + $0x1f8] sm:$0xff]  ;;  %v738_v30 = vld [vmem:[#allocation6 + $0x170] sm:$0xff]  ;;  %545 = vmatprep.subr.bf16.mxu0 %v544_v8  ;;  %v554_v32 = vpack.c.bf16 %v732_v22, %v730_v21 }
  0x3c   :  { %575 = vmatpush3.bf16.msra.mxu1 %v574_v7  ;;  %v584_v33 = vpack.c.bf16 %v237_v29, %v236_v28  ;;  %v221_v34 = vld [vmem:[#allocation6 + $0x178] sm:$0xff]  ;;  %v44_v35 = vld [vmem:[#allocation3] sm:$0xff] }
  0x3d   :  { %v45_v36 = vld [vmem:[#allocation3 + $0x8] sm:$0xff]  ;;  %577 = vmatprep.subr.bf16.mxu1 %v576_v14  ;;  %v586_v38 = vpack.c.bf16 %v221_v34, %v738_v30  ;;  %v48_v39 = vcombine.high %v44_v35, %v44_v35  ;;  %v53_v41 = vsel %vm52_vm0, %v44_v35, 0.0  ;;  %v81_v44 = vsel %vm52_vm0, %v44_v35, -inf }
  0x3e   :  { %v49_v40 = vcombine.high %v45_v36, %v45_v36  ;;  %v54_v42 = vrot.slane %v53_v41, 4  ;;  %v67_v43 = vsel %vm52_vm0, %v45_v36, 0.0  ;;  %v95_v45 = vsel %vm52_vm0, %v45_v36, -inf  ;;  %547 = vmatpush3.bf16.msra.mxu0 %v546_v18 }
  0x3f   :  { %v60_v46 = vsel %vm52_vm0, %v48_v39, 0.0  ;;  %v68_v47 = vrot.slane %v67_v43, 4  ;;  %v82_v49 = vrot.slane %v81_v44, 4  ;;  %549 = vmatprep.subr.bf16.mxu0 %v548_v24  ;;  %v88_v53 = vsel %vm52_vm0, %v48_v39, -inf }
  0x40   :  { %v74_v48 = vsel %vm52_vm0, %v49_v40, 0.0  ;;  %579 = vmatpush3.bf16.msra.mxu1 %v578_v19  ;;  %v55_v50 = vadd.f32 %v54_v42, %v53_v41  ;;  %v61_v51 = vrot.slane %v60_v46, 4  ;;  %v89_v56 = vrot.slane %v88_v53, 4 }
  0x41   :  { %v75_v52 = vrot.slane %v74_v48, 4  ;;  %581 = vmatprep.subr.bf16.mxu1 %v580_v26  ;;  %v69_v54 = vadd.f32 %v68_v47, %v67_v43  ;;  %v83_v55 = vmax.f32 %v81_v44, %v82_v49  ;;  %v96_v57 = vrot.slane %v95_v45, 4 }
  0x42   :  { %v56_v58 = vrot.slane %v55_v50, 2  ;;  %v62_v59 = vadd.f32 %v61_v51, %v60_v46  ;;  %v102_v61 = vsel %vm52_vm0, %v49_v40, -inf  ;;  %551 = vmatpush3.bf16.msra.mxu0 %v550_v25  ;;  %v90_v0 = vmax.f32 %v88_v53, %v89_v56 }
  0x43   :  { %v76_v60 = vadd.f32 %v75_v52, %v74_v48  ;;  %v70_v62 = vrot.slane %v69_v54, 2  ;;  %v84_v63 = vrot.slane %v83_v55, 2  ;;  %v97_v1 = vmax.f32 %v95_v45, %v96_v57  ;;  %553 = vmatprep.subr.bf16.mxu0 %v552_v31 }
  0x44   :  { %583 = vmatpush3.bf16.msra.mxu1 %v582_v27  ;;  %v57_v2 = vadd.f32 %v56_v58, %v55_v50  ;;  %v63_v3 = vrot.slane %v62_v59, 2  ;;  %v103_v5 = vrot.slane %v102_v61, 4  ;;  %v91_v8 = vrot.slane %v90_v0, 2 }
  0x45   :  { %v77_v4 = vrot.slane %v76_v60, 2  ;;  %585 = vmatprep.subr.bf16.mxu1 %v584_v33  ;;  %v71_v6 = vadd.f32 %v70_v62, %v69_v54  ;;  %v85_v7 = vmax.f32 %v83_v55, %v84_v63  ;;  %v98_v9 = vrot.slane %v97_v1, 2 }
  0x46   :  { %v58_v10 = vrot.slane %v57_v2, 1  ;;  %v64_v11 = vadd.f32 %v63_v3, %v62_v59  ;;  %v104_v14 = vmax.f32 %v102_v61, %v103_v5  ;;  %555 = vmatpush3.bf16.msra.mxu0 %v554_v32  ;;  %v92_v17 = vmax.f32 %v90_v0, %v91_v8 }
  0x47   :  { %v78_v12 = vadd.f32 %v77_v4, %v76_v60  ;;  %v72_v15 = vrot.slane %v71_v6, 1  ;;  %v86_v16 = vrot.slane %v85_v7, 1  ;;  %v99_v18 = vmax.f32 %v97_v1, %v98_v9 }
  0x48   :  { %587 = vmatpush3.bf16.msra.mxu1 %v586_v38  ;;  %v59_v19 = vadd.f32 %v58_v10, %v57_v2  ;;  %v65_v20 = vrot.slane %v64_v11, 1  ;;  %v105_v22 = vrot.slane %v104_v14, 2  ;;  %v93_v25 = vrot.slane %v92_v17, 1 }
  0x49   :  { %v79_v21 = vrot.slane %v78_v12, 1  ;;  %v73_v24 = vadd.f32 %v72_v15, %v71_v6  ;;  %v100_v26 = vrot.slane %v99_v18, 1  ;;  %v119_v27 = vsub.s32 %v116_v37, %v734_v23 }
  0x4a   :  { %v66_v28 = vadd.f32 %v65_v20, %v64_v11  ;;  %v87_v30 = vmax.f32 %v85_v7, %v86_v16  ;;  %v106_v31 = vmax.f32 %v104_v14, %v105_v22  ;;  %v94_v32 = vmax.f32 %v92_v17, %v93_v25 }
  0x4b   :  { %v80_v29 = vadd.f32 %v79_v21, %v78_v12  ;;  %v101_v33 = vmax.f32 %v99_v18, %v100_v26  ;;  %v681_v5 = vmov 1966171168  }
  0x4c   :  { %v107_v34 = vrot.slane %v106_v31, 1  ;;  %v113_v35 = vcombine.low %v59_v19, %v66_v28  ;;  %v148_v41 = vcombine.low %v87_v30, %v94_v32  ;;  %v408_v6 = vunpack.c.l.s4 %v681_v5 }
  0x4d   :  { %v121_v36 = vcombine.low %v73_v24, %v80_v29 }
  0x4e   :  { %v108_v38 = vmax.f32 %v106_v31, %v107_v34  ;;  %v120_v39 = vrot.slane %v113_v35, %v119_v27  ;;  %v155_v37 = vrot.slane %v148_v41, %v119_v27  ;;  %v409_v7 = vunpack.c.0.s8 %v408_v6 }
  0x4f   :  { %v128_v40 = vrot.slane %v121_v36, %v119_v27 }
  0x50   :  { %v156_v43 = vcombine.low %v101_v33, %v108_v38  ;;  %v412_v8 = vsub.s32 %v409_v7, %v734_v23 }
  0x51   :  { %v133_v42 = vrot.slane %v128_v40, 7 }
  0x52   :  { %v163_v44 = vrot.slane %v156_v43, %v119_v27 }
  0x53   :  { %v135_v13 = vsel %vm134_vm1, %v133_v42, %v120_v39 }
  0x54   :  { %v137_v45 = vsel %vm136_vm2, %v133_v42, %v135_v13  ;;  %v166_v47 = vrot.slane %v163_v44, 7 }
  0x55   :  { %v139_v46 = vsel %vm138_vm3, %v133_v42, %v137_v45 }
  0x56   :  { %v141_v48 = vsel %vm140_vm4, %v133_v42, %v139_v46  ;;  %v167_v49 = vsel %vm134_vm1, %v166_v47, %v155_v37 }
  0x57   :  { %143 = vst [vmem:[#allocation2] sm:$0xf] %v141_v48  ;;  %v168_v50 = vsel %vm136_vm2, %v166_v47, %v167_v49 }
  0x58   :  { %v169_v51 = vsel %vm138_vm3, %v166_v47, %v168_v50 }
  0x59   :  { %v170_v52 = vsel %vm140_vm4, %v166_v47, %v169_v51 }
  0x5a   :  { %172 = vst [vmem:[#allocation2 + $0x4] sm:$0xf] %v170_v52 }
  0x61   :  { %v173_v53 = vld [vmem:[#allocation2] sm:$0xff] }
  0x62   :  { %v246_v54 = vrot.slane %v173_v53, %v119_v27  ;;  %v239_v55 = vcombine.high %v173_v53, %v173_v53 }
  0x64   :  { %v254_v56 = vcombine.high %v246_v54, %v246_v54  ;;  %v253_v57 = vrot.slane %v239_v55, %v119_v27 }
  0x66   :  { %324 = vmatprep.mubr.f32.mxu0 %v254_v56  ;;  %v255_v58 = vcombine.high %v253_v57, %v253_v57 }
  0x67   :  { %325 = vmatmul.mubr.f32.vlgmr.msra.gmra.mrb[0].mxu0 %v246_v54 }
  0x68   :  { %394 = vmatprep.mubr.f32.mxu1 %v255_v58 }
  0x69   :  { %395 = vmatmul.mubr.f32.vlgmr.msra.gmra.mrb[0].mxu1 %v253_v57 }
 0x13a   :  { %v486_v59 = vpop.f32.mrb[0].mxu0 }
 0x13b   :  { %v487_v60 = vpop.f32.mrb[1].mxu0 }
 0x13c   :  { %v488_v61 = vadd.f32 %v487_v60, %v486_v59  ;;  %v521_v62 = vpop.f32.mrb[0].mxu1 }
 0x13d   :  { %v522_v63 = vpop.f32.mrb[1].mxu1 }
 0x13e   :  { %v523_v0 = vadd.f32 %v522_v63, %v521_v62 }
 0x140   :  { %v397_v1 = vadd.f32 %v523_v0, %v488_v61 }
 0x142   :  { %v451_v2 = vmul.f32 -1.442695, %v397_v1 }
 0x144   :  { %600 = vpow2.f32 %v451_v2 }
 0x14e   :  { %v601_v3 = vpop.eup %600 }
 0x14f   :  { %v403_v4 = vadd.f32 1.0, %v601_v3 }
 0x151   :  { %602 = vrcp.f32 %v403_v4 }
 0x15b   :  { %v603_v9 = vpop.eup %602 }
 0x15c   :  { %v413_v10 = vrot.slane %v603_v9, %v412_v8 }
 0x15e   :  { %v414_v11 = vcombine.high %v413_v10, %v413_v10  ;;  %452 = vst.sshfl [vmem:[#allocation8] sm:$0x1 pattern:$0x73625140] %v413_v10 }
 0x160   :  { %453 = vst.sshfl [vmem:[#allocation8 + $0x1] sm:$0x1 pattern:$0x73625140] %v414_v11 }
 0x161   :  { %659 = shalt.err (!%p656_p6)
}
 0x162   :  { %s660_s10 = scalar_lea.hbm %s770_s2, 32 }
 0x163   :  { %p661_p7 = scmp.ne.s32.totalorder %s770_s2, %s660_s10  ;;  %p664_p8 = scmp.lt.u32.totalorder %s660_s10, %s770_s2 }
 0x165   :  { %p666_p9 = pnand %p664_p8, %p661_p7 }
 0x167   :  { %669 = shalt.err (!%p666_p9)
}
 0x168   :  { %s683_s15 = smov 16   ;;  %s684_s16 = smov 1  }
 0x169   :  { %444 = dma.vmem_to_hbm [thread:$0]  %s439_s6, 32, %s770_s2, [#allocation5], %s683_s15, %s683_s15, %s684_s16  }
 0x16a   :  { %674 = dma.done.wait [#allocation5], 32  }
 0x16b   :  { %675 = vsyncadd [#allocation5], 4294967264 }
 0x16c   :  { %448 = vsyncpa [#allocation4], 1 }
 0x16d   :  { %449 = vsyncpa [#allocation7], 1 }
 0x16e   :  { %450 = vsyncpa [#allocation5], 1 }

</bundles_post_ra>
